<compile_context>
chip_gen: v5e
topology: v5e:2x2
jax: 0.10.0
libtpu: 0.0.40
codegen_flags: <defaults>
</compile_context>

<pallas_src>
import jax
import jax.numpy as jnp
from jax.experimental import pallas as pl
from jax.experimental.pallas import tpu as pltpu


# ----------------------------------------------------------------------------
# Kernel: one fused matmul + bias row.
# ----------------------------------------------------------------------------
def discrete_network_kernel(x_ref, w_ref, b_ref, o_ref):
    # (B_tile, C*L) @ (C*L, O) -> (B_tile, O), f32 accumulation on the MXU.
    out = jnp.dot(x_ref[...], w_ref[...], preferred_element_type=jnp.float32)
    o_ref[...] = (out + b_ref[...]).astype(o_ref.dtype)


# ----------------------------------------------------------------------------
# One-time parameter fusion (call at parameter-load time, NOT per forward).
# ----------------------------------------------------------------------------
def prepare_discrete_network_params(w_conv, b_conv, w_lin, b_lin,
                                    dtype=jnp.float32):
    """Fuse Conv1d(k=1) + Linear into a single (C*L, O) weight and (1, O) bias.

    w_conv: (1, C, 1)   b_conv: (1,)   w_lin: (O, L)   b_lin: (O,)

    NOTE: w_fused assumes the activation is flattened row-major as
    x.reshape(B, C*L)  (flat index = c*L + l, i.e. NCL layout).  If the input
    layout ever changes (e.g. NLC), this fusion must change with it.
    """
    C = w_conv.shape[1]
    O, L = w_lin.shape
    wc = w_conv.reshape(C).astype(jnp.float32)                       # (C,)
    wl = w_lin.T.astype(jnp.float32)                                 # (L, O)
    w_fused = (wc[:, None, None] * wl[None, :, :]).reshape(C * L, O)  # (C*L, O)
    b_fused = (b_lin.astype(jnp.float32) +
               b_conv.astype(jnp.float32)[0] * wl.sum(axis=0)).reshape(1, O)
    return w_fused.astype(dtype), b_fused.astype(jnp.float32)


# ----------------------------------------------------------------------------
# Forward wrapper.
# ----------------------------------------------------------------------------
def discrete_network_forward(x, w_fused, b_fused, *, block_b=512):
    """x: (B, C, L); w_fused: (C*L, O); b_fused: (1, O)."""
    B = x.shape[0]
    CL, O = w_fused.shape

    # Row-major (c-major, l-minor) flatten — must match w_fused's layout.
    x_flat = x.reshape(B, CL)
    if x_flat.dtype != w_fused.dtype:
        # Only cast when needed (no blanket f32 upcast of the big operand).
        x_flat = x_flat.astype(w_fused.dtype)

    if B <= block_b:
        # Small batch: no grid, no pipeline machinery.  Everything (a few
        # tens of KiB) lives in VMEM at once; single matmul + whole-block store.
        return pl.pallas_call(
            discrete_network_kernel,
            out_shape=jax.ShapeDtypeStruct((B, O), jnp.float32),
            in_specs=[
                pl.BlockSpec(memory_space=pltpu.MemorySpace.VMEM),
                pl.BlockSpec(memory_space=pltpu.MemorySpace.VMEM),
                pl.BlockSpec(memory_space=pltpu.MemorySpace.VMEM),
            ],
            out_specs=pl.BlockSpec(memory_space=pltpu.MemorySpace.VMEM),
        )(x_flat, w_fused, b_fused)

    # Large batch: tile ONLY the batch axis.  Full lane-dense K=C*L per tile,
    # weights/bias stay resident (index_map -> (0, 0)).  No reduction axis
    # => no accumulator scratch, no init/finalize.
    tb = block_b
    b_pad = pl.cdiv(B, tb) * tb
    if b_pad != B:
        x_flat = jnp.pad(x_flat, ((0, b_pad - B), (0, 0)))

    out = pl.pallas_call(
        discrete_network_kernel,
        out_shape=jax.ShapeDtypeStruct((b_pad, O), jnp.float32),
        grid=(b_pad // tb,),
        in_specs=[
            pl.BlockSpec((tb, CL), lambda i: (i, 0)),
            pl.BlockSpec((CL, O), lambda i: (0, 0)),
            pl.BlockSpec((1, O), lambda i: (0, 0)),
        ],
        out_specs=pl.BlockSpec((tb, O), lambda i: (i, 0)),
        compiler_params=pltpu.CompilerParams(
            dimension_semantics=("parallel",),
        ),
    )(x_flat, w_fused, b_fused)
    return out[:B]


# ----------------------------------------------------------------------------
# Pure-JAX reference mirroring the PyTorch forward (conv k=1 -> flatten -> linear).
# ----------------------------------------------------------------------------
def discrete_network_reference(x, w_conv, b_conv, w_lin, b_lin):
    C = x.shape[1]
    y = jnp.einsum("c,bcl->bl", w_conv.reshape(C), x) + b_conv[0]
    return y @ w_lin.T + b_lin


if __name__ == "__main__":
    B = 4            # batch
    input_dim = 64   # conv in_channels
    seq_len = 24     # sequence_length
    out_dim = 2      # output_dim

    key = jax.random.PRNGKey(0)
    kx, kwc, kbc, kwl, kbl = jax.random.split(key, 5)

    x = jax.random.normal(kx, (B, input_dim, seq_len), dtype=jnp.float32)

    # Deterministic synthetic parameters (same shapes as nn.Conv1d / nn.Linear).
    w_conv = jax.random.normal(kwc, (1, input_dim, 1), dtype=jnp.float32) * 0.1
    b_conv = jax.random.normal(kbc, (1,), dtype=jnp.float32) * 0.1
    w_lin = jax.random.normal(kwl, (out_dim, seq_len), dtype=jnp.float32) * 0.1
    b_lin = jax.random.normal(kbl, (out_dim,), dtype=jnp.float32) * 0.1

    # Parameter fusion is done ONCE here (parameter-load time), not per call.
    w_fused, b_fused = prepare_discrete_network_params(w_conv, b_conv, w_lin, b_lin)

    # --- small-batch (no-grid) path ---
    out = discrete_network_forward(x, w_fused, b_fused)
    out = jax.block_until_ready(out)

    ref = discrete_network_reference(x, w_conv, b_conv, w_lin, b_lin)
    assert out.shape == (B, out_dim), out.shape
    assert jnp.allclose(out, ref, atol=1e-4, rtol=1e-4), (out, ref)

    # --- batch-tiled path smoke test (exercises the grid/"parallel" branch) ---
    B2 = 16
    x2 = jax.random.normal(jax.random.PRNGKey(1), (B2, input_dim, seq_len),
                           dtype=jnp.float32)
    out2 = discrete_network_forward(x2, w_fused, b_fused, block_b=8)
    out2 = jax.block_until_ready(out2)
    ref2 = discrete_network_reference(x2, w_conv, b_conv, w_lin, b_lin)
    assert out2.shape == (B2, out_dim), out2.shape
    assert jnp.allclose(out2, ref2, atol=1e-4, rtol=1e-4), (out2, ref2)

    print("KERNEL_OK")
</pallas_src>

<mosaic_0001>
module attributes {stable_mosaic.version = 11 : i64} {
  func.func @discrete_network_kernel(%arg0: memref<4x1536xf32, #tpu.memory_space<vmem>>, %arg1: memref<1536x2xf32, #tpu.memory_space<vmem>>, %arg2: memref<1x2xf32, #tpu.memory_space<vmem>>, %arg3: memref<4x2xf32, #tpu.memory_space<vmem>>) attributes {dimension_semantics = [], scalar_prefetch = 0 : i64, scratch_operands = 0 : i64, tpu.core_type = #tpu.core_type<tc>} {
    %c0 = arith.constant 0 : index
    %c0_0 = arith.constant 0 : index
    %0 = vector.load %arg0[%c0, %c0_0] : memref<4x1536xf32, #tpu.memory_space<vmem>>, vector<4x1536xf32>
    %c0_1 = arith.constant 0 : index
    %c0_2 = arith.constant 0 : index
    %1 = vector.load %arg1[%c0_1, %c0_2] : memref<1536x2xf32, #tpu.memory_space<vmem>>, vector<1536x2xf32>
    %cst = arith.constant dense<0.000000e+00> : vector<4x2xf32>
    %2 = tpu.matmul %0, %1, %cst {dimension_numbers = #tpu.dot_dimension_numbers<[1], [0], [0], [1], [0, 0, 1, 1], [], []>} : vector<4x1536xf32>, vector<1536x2xf32>, vector<4x2xf32> -> vector<4x2xf32>
    %c0_3 = arith.constant 0 : index
    %c0_4 = arith.constant 0 : index
    %3 = vector.load %arg2[%c0_3, %c0_4] : memref<1x2xf32, #tpu.memory_space<vmem>>, vector<1x2xf32>
    %4 = vector.broadcast %3 : vector<1x2xf32> to vector<4x2xf32>
    %5 = arith.addf %2, %4 : vector<4x2xf32>
    %c0_5 = arith.constant 0 : index
    %c0_6 = arith.constant 0 : index
    %6 = vector.load %arg3[%c0_5, %c0_6] : memref<4x2xf32, #tpu.memory_space<vmem>>, vector<4x2xf32>
    tpu.vector_store %arg3[%c0_5, %c0_6], %5 {strides = array<i32>} : memref<4x2xf32, #tpu.memory_space<vmem>>, vector<4x2xf32>,
    return
  }
}

</mosaic_0001>

<bundles_post_ra>
// kernel: tpu_custom_call.1
= control target key start
LH: loop header
LB: loop body
LE: loop exit
PB: predicated region body
PF: predicated region fallthrough
CT: control target
= control target key end

     0   :  { %vm495_vm0 = vcmask 11264   ;;  %s1125_s1 = inlined_call_operand.vmem [shape: f32[1536,2], index: 1, kind: input, shape index: {}]   ;;  %s1126_s0 = inlined_call_operand.vmem [shape: f32[4,1536], index: 0, kind: input, shape index: {}]   ;;  %s1127_s2 = inlined_call_operand.vmem [shape: f32[1,2], index: 2, kind: input, shape index: {}]   ;;  %s1128_s3 = inlined_call_operand.vmem [shape: f32[4,2], index: 3, kind: output, shape index: {}]  }
   0x1   :  { %v35_v0 = vld [vmem:[%s1125_s1 + $0x78] sm:$0xff]  ;;  %v34_v2 = vld [vmem:[%s1125_s1 + $0x70] sm:$0xff]  ;;  %v33_v6 = vld [vmem:[%s1125_s1 + $0x68] sm:$0xff] }
   0x2   :  { %v67_v1 = vld [vmem:[%s1125_s1 + $0x178] sm:$0xff]  ;;  %255 = vmatpush.msra.mxu0 %v35_v0  ;;  %v66_v4 = vld [vmem:[%s1125_s1 + $0x170] sm:$0xff]  ;;  %v65_v8 = vld [vmem:[%s1125_s1 + $0x168] sm:$0xff] }
   0x3   :  { %295 = vmatpush.msra.mxu2 %v67_v1  ;;  %v51_v3 = vld [vmem:[%s1125_s1 + $0xf8] sm:$0xff]  ;;  %v50_v7 = vld [vmem:[%s1125_s1 + $0xf0] sm:$0xff]  ;;  %v49_v10 = vld [vmem:[%s1125_s1 + $0xe8] sm:$0xff] }
   0x4   :  { %v83_v5 = vld [vmem:[%s1125_s1 + $0x1f8] sm:$0xff]  ;;  %275 = vmatpush.msra.mxu1 %v51_v3  ;;  %256 = vmatpush.msra.mxu0 %v34_v2  ;;  %v82_v9 = vld [vmem:[%s1125_s1 + $0x1f0] sm:$0xff]  ;;  %v32_v11 = vld [vmem:[%s1125_s1 + $0x60] sm:$0xff] }
   0x5   :  { %315 = vmatpush.msra.mxu3 %v83_v5  ;;  %296 = vmatpush.msra.mxu2 %v66_v4  ;;  %v64_v12 = vld [vmem:[%s1125_s1 + $0x160] sm:$0xff]  ;;  %v81_v13 = vld [vmem:[%s1125_s1 + $0x1e8] sm:$0xff]  ;;  %v31_v16 = vld [vmem:[%s1125_s1 + $0x58] sm:$0xff] }
   0x6   :  { %276 = vmatpush.msra.mxu1 %v50_v7  ;;  %257 = vmatpush.msra.mxu0 %v33_v6  ;;  %v48_v14 = vld [vmem:[%s1125_s1 + $0xe0] sm:$0xff]  ;;  %v63_v17 = vld [vmem:[%s1125_s1 + $0x158] sm:$0xff]  ;;  %v30_v20 = vld [vmem:[%s1125_s1 + $0x50] sm:$0xff] }
   0x7   :  { %316 = vmatpush.msra.mxu3 %v82_v9  ;;  %297 = vmatpush.msra.mxu2 %v65_v8  ;;  %v80_v15 = vld [vmem:[%s1125_s1 + $0x1e0] sm:$0xff]  ;;  %v47_v18 = vld [vmem:[%s1125_s1 + $0xd8] sm:$0xff]  ;;  %v62_v21 = vld [vmem:[%s1125_s1 + $0x150] sm:$0xff] }
   0x8   :  { %277 = vmatpush.msra.mxu1 %v49_v10  ;;  %258 = vmatpush.msra.mxu0 %v32_v11  ;;  %v79_v19 = vld [vmem:[%s1125_s1 + $0x1d8] sm:$0xff]  ;;  %v46_v22 = vld [vmem:[%s1125_s1 + $0xd0] sm:$0xff]  ;;  %v29_v24 = vld [vmem:[%s1125_s1 + $0x48] sm:$0xff] }
   0x9   :  { %317 = vmatpush.msra.mxu3 %v81_v13  ;;  %298 = vmatpush.msra.mxu2 %v64_v12  ;;  %v78_v23 = vld [vmem:[%s1125_s1 + $0x1d0] sm:$0xff]  ;;  %v61_v25 = vld [vmem:[%s1125_s1 + $0x148] sm:$0xff]  ;;  %v28_v28 = vld [vmem:[%s1125_s1 + $0x40] sm:$0xff] }
   0xa   :  { %278 = vmatpush.msra.mxu1 %v48_v14  ;;  %259 = vmatpush.msra.mxu0 %v31_v16  ;;  %v45_v26 = vld [vmem:[%s1125_s1 + $0xc8] sm:$0xff]  ;;  %v60_v29 = vld [vmem:[%s1125_s1 + $0x140] sm:$0xff]  ;;  %v27_v32 = vld [vmem:[%s1125_s1 + $0x38] sm:$0xff] }
   0xb   :  { %318 = vmatpush.msra.mxu3 %v80_v15  ;;  %299 = vmatpush.msra.mxu2 %v63_v17  ;;  %v77_v27 = vld [vmem:[%s1125_s1 + $0x1c8] sm:$0xff]  ;;  %v44_v30 = vld [vmem:[%s1125_s1 + $0xc0] sm:$0xff]  ;;  %v59_v33 = vld [vmem:[%s1125_s1 + $0x138] sm:$0xff] }
   0xc   :  { %279 = vmatpush.msra.mxu1 %v47_v18  ;;  %260 = vmatpush.msra.mxu0 %v30_v20  ;;  %v76_v31 = vld [vmem:[%s1125_s1 + $0x1c0] sm:$0xff]  ;;  %v43_v34 = vld [vmem:[%s1125_s1 + $0xb8] sm:$0xff]  ;;  %v26_v36 = vld [vmem:[%s1125_s1 + $0x30] sm:$0xff] }
   0xd   :  { %319 = vmatpush.msra.mxu3 %v79_v19  ;;  %300 = vmatpush.msra.mxu2 %v62_v21  ;;  %v75_v35 = vld [vmem:[%s1125_s1 + $0x1b8] sm:$0xff]  ;;  %v58_v37 = vld [vmem:[%s1125_s1 + $0x130] sm:$0xff]  ;;  %v25_v40 = vld [vmem:[%s1125_s1 + $0x28] sm:$0xff] }
   0xe   :  { %280 = vmatpush.msra.mxu1 %v46_v22  ;;  %261 = vmatpush.msra.mxu0 %v29_v24  ;;  %v42_v38 = vld [vmem:[%s1125_s1 + $0xb0] sm:$0xff]  ;;  %v57_v41 = vld [vmem:[%s1125_s1 + $0x128] sm:$0xff]  ;;  %v24_v44 = vld [vmem:[%s1125_s1 + $0x20] sm:$0xff] }
   0xf   :  { %320 = vmatpush.msra.mxu3 %v78_v23  ;;  %301 = vmatpush.msra.mxu2 %v61_v25  ;;  %v74_v39 = vld [vmem:[%s1125_s1 + $0x1b0] sm:$0xff]  ;;  %v41_v42 = vld [vmem:[%s1125_s1 + $0xa8] sm:$0xff]  ;;  %v56_v45 = vld [vmem:[%s1125_s1 + $0x120] sm:$0xff] }
  0x10   :  { %281 = vmatpush.msra.mxu1 %v45_v26  ;;  %262 = vmatpush.msra.mxu0 %v28_v28  ;;  %v73_v43 = vld [vmem:[%s1125_s1 + $0x1a8] sm:$0xff]  ;;  %v40_v46 = vld [vmem:[%s1125_s1 + $0xa0] sm:$0xff]  ;;  %v23_v48 = vld [vmem:[%s1125_s1 + $0x18] sm:$0xff] }
  0x11   :  { %321 = vmatpush.msra.mxu3 %v77_v27  ;;  %302 = vmatpush.msra.mxu2 %v60_v29  ;;  %v72_v47 = vld [vmem:[%s1125_s1 + $0x1a0] sm:$0xff]  ;;  %v55_v49 = vld [vmem:[%s1125_s1 + $0x118] sm:$0xff]  ;;  %v22_v52 = vld [vmem:[%s1125_s1 + $0x10] sm:$0xff] }
  0x12   :  { %282 = vmatpush.msra.mxu1 %v44_v30  ;;  %263 = vmatpush.msra.mxu0 %v27_v32  ;;  %v39_v50 = vld [vmem:[%s1125_s1 + $0x98] sm:$0xff]  ;;  %v54_v53 = vld [vmem:[%s1125_s1 + $0x110] sm:$0xff]  ;;  %v21_v56 = vld [vmem:[%s1125_s1 + $0x8] sm:$0xff] }
  0x13   :  { %322 = vmatpush.msra.mxu3 %v76_v31  ;;  %303 = vmatpush.msra.mxu2 %v59_v33  ;;  %v71_v51 = vld [vmem:[%s1125_s1 + $0x198] sm:$0xff]  ;;  %v38_v54 = vld [vmem:[%s1125_s1 + $0x90] sm:$0xff]  ;;  %v53_v57 = vld [vmem:[%s1125_s1 + $0x108] sm:$0xff] }
  0x14   :  { %283 = vmatpush.msra.mxu1 %v43_v34  ;;  %264 = vmatpush.msra.mxu0 %v26_v36  ;;  %v70_v55 = vld [vmem:[%s1125_s1 + $0x190] sm:$0xff]  ;;  %v37_v58 = vld [vmem:[%s1125_s1 + $0x88] sm:$0xff]  ;;  %v20_v60 = vld [vmem:[%s1125_s1] sm:$0xff] }
  0x15   :  { %323 = vmatpush.msra.mxu3 %v75_v35  ;;  %304 = vmatpush.msra.mxu2 %v58_v37  ;;  %v69_v59 = vld [vmem:[%s1125_s1 + $0x188] sm:$0xff]  ;;  %v52_v61 = vld [vmem:[%s1125_s1 + $0x100] sm:$0xff]  ;;  %v99_v62 = vld [vmem:[%s1125_s1 + $0x278] sm:$0xff] }
  0x16   :  { %284 = vmatpush.msra.mxu1 %v42_v38  ;;  %265 = vmatpush.msra.mxu0 %v25_v40  ;;  %v131_v63 = vld [vmem:[%s1125_s1 + $0x378] sm:$0xff]  ;;  %v36_v0 = vld [vmem:[%s1125_s1 + $0x80] sm:$0xff]  ;;  %v98_v2 = vld [vmem:[%s1125_s1 + $0x270] sm:$0xff] }
  0x17   :  { %324 = vmatpush.msra.mxu3 %v74_v39  ;;  %305 = vmatpush.msra.mxu2 %v57_v41  ;;  %v68_v1 = vld [vmem:[%s1125_s1 + $0x180] sm:$0xff]  ;;  %v115_v3 = vld [vmem:[%s1125_s1 + $0x2f8] sm:$0xff]  ;;  %v130_v4 = vld [vmem:[%s1125_s1 + $0x370] sm:$0xff] }
  0x18   :  { %285 = vmatpush.msra.mxu1 %v41_v42  ;;  %266 = vmatpush.msra.mxu0 %v24_v44  ;;  %v147_v5 = vld [vmem:[%s1125_s1 + $0x3f8] sm:$0xff]  ;;  %v97_v6 = vld [vmem:[%s1125_s1 + $0x268] sm:$0xff]  ;;  %v114_v7 = vld [vmem:[%s1125_s1 + $0x2f0] sm:$0xff] }
  0x19   :  { %325 = vmatpush.msra.mxu3 %v73_v43  ;;  %306 = vmatpush.msra.mxu2 %v56_v45  ;;  %v129_v8 = vld [vmem:[%s1125_s1 + $0x368] sm:$0xff]  ;;  %v146_v9 = vld [vmem:[%s1125_s1 + $0x3f0] sm:$0xff]  ;;  %v96_v10 = vld [vmem:[%s1125_s1 + $0x260] sm:$0xff] }
  0x1a   :  { %286 = vmatpush.msra.mxu1 %v40_v46  ;;  %267 = vmatpush.msra.mxu0 %v23_v48  ;;  %v113_v11 = vld [vmem:[%s1125_s1 + $0x2e8] sm:$0xff]  ;;  %v128_v12 = vld [vmem:[%s1125_s1 + $0x360] sm:$0xff]  ;;  %v95_v14 = vld [vmem:[%s1125_s1 + $0x258] sm:$0xff] }
  0x1b   :  { %326 = vmatpush.msra.mxu3 %v72_v47  ;;  %307 = vmatpush.msra.mxu2 %v55_v49  ;;  %v145_v13 = vld [vmem:[%s1125_s1 + $0x3e8] sm:$0xff]  ;;  %v112_v15 = vld [vmem:[%s1125_s1 + $0x2e0] sm:$0xff]  ;;  %v127_v16 = vld [vmem:[%s1125_s1 + $0x358] sm:$0xff] }
  0x1c   :  { %287 = vmatpush.msra.mxu1 %v39_v50  ;;  %268 = vmatpush.msra.mxu0 %v22_v52  ;;  %v144_v17 = vld [vmem:[%s1125_s1 + $0x3e0] sm:$0xff]  ;;  %v94_v18 = vld [vmem:[%s1125_s1 + $0x250] sm:$0xff]  ;;  %v111_v19 = vld [vmem:[%s1125_s1 + $0x2d8] sm:$0xff] }
  0x1d   :  { %327 = vmatpush.msra.mxu3 %v71_v51  ;;  %308 = vmatpush.msra.mxu2 %v54_v53  ;;  %v126_v20 = vld [vmem:[%s1125_s1 + $0x350] sm:$0xff]  ;;  %v143_v21 = vld [vmem:[%s1125_s1 + $0x3d8] sm:$0xff]  ;;  %v93_v22 = vld [vmem:[%s1125_s1 + $0x248] sm:$0xff] }
  0x1e   :  { %288 = vmatpush.msra.mxu1 %v38_v54  ;;  %269 = vmatpush.msra.mxu0 %v21_v56  ;;  %v110_v23 = vld [vmem:[%s1125_s1 + $0x2d0] sm:$0xff]  ;;  %v125_v24 = vld [vmem:[%s1125_s1 + $0x348] sm:$0xff]  ;;  %v14_v26 = vld [vmem:[%s1126_s0] sm:$0xff] }
  0x1f   :  { %328 = vmatpush.msra.mxu3 %v70_v55  ;;  %309 = vmatpush.msra.mxu2 %v53_v57  ;;  %v142_v25 = vld [vmem:[%s1125_s1 + $0x3d0] sm:$0xff]  ;;  %v15_v27 = vld [vmem:[%s1126_s0 + $0x8] sm:$0xff]  ;;  %v92_v28 = vld [vmem:[%s1125_s1 + $0x240] sm:$0xff]  ;;  %222 = vst [vmem:[#allocation1] ss:$2 sm:$0xff] %v14_v26 }
  0x20   :  { %289 = vmatpush.msra.mxu1 %v37_v58  ;;  %270 = vmatpush.msra.mxu0 %v20_v60  ;;  %v109_v29 = vld [vmem:[%s1125_s1 + $0x2c8] sm:$0xff]  ;;  %v124_v30 = vld [vmem:[%s1125_s1 + $0x340] sm:$0xff]  ;;  %v91_v32 = vld [vmem:[%s1125_s1 + $0x238] sm:$0xff]  ;;  %224 = vst [vmem:[#allocation1 + $0x10] ss:$2 sm:$0xff] %v15_v27 }
  0x21   :  { %329 = vmatpush.msra.mxu3 %v69_v59  ;;  %310 = vmatpush.msra.mxu2 %v52_v61  ;;  %v141_v31 = vld [vmem:[%s1125_s1 + $0x3c8] sm:$0xff]  ;;  %v108_v33 = vld [vmem:[%s1125_s1 + $0x2c0] sm:$0xff]  ;;  %v123_v34 = vld [vmem:[%s1125_s1 + $0x338] sm:$0xff] }
  0x22   :  { %335 = vmatpush.msrb.mxu0 %v99_v62  ;;  %290 = vmatpush.msra.mxu1 %v36_v0  ;;  %v140_v35 = vld [vmem:[%s1125_s1 + $0x3c0] sm:$0xff]  ;;  %v90_v36 = vld [vmem:[%s1125_s1 + $0x230] sm:$0xff]  ;;  %v107_v37 = vld [vmem:[%s1125_s1 + $0x2b8] sm:$0xff] }
  0x23   :  { %375 = vmatpush.msrb.mxu2 %v131_v63  ;;  %330 = vmatpush.msra.mxu3 %v68_v1  ;;  %v122_v38 = vld [vmem:[%s1125_s1 + $0x330] sm:$0xff]  ;;  %v139_v39 = vld [vmem:[%s1125_s1 + $0x3b8] sm:$0xff]  ;;  %v89_v40 = vld [vmem:[%s1125_s1 + $0x228] sm:$0xff] }
  0x24   :  { %336 = vmatpush.msrb.mxu0 %v98_v2  ;;  %355 = vmatpush.msrb.mxu1 %v115_v3  ;;  %v106_v41 = vld [vmem:[%s1125_s1 + $0x2b0] sm:$0xff]  ;;  %v121_v42 = vld [vmem:[%s1125_s1 + $0x328] sm:$0xff]  ;;  %v18_v44 = vld [vmem:[%s1126_s0 + $0x20] sm:$0xff] }
  0x25   :  { %376 = vmatpush.msrb.mxu2 %v130_v4  ;;  %395 = vmatpush.msrb.mxu3 %v147_v5  ;;  %v138_v43 = vld [vmem:[%s1125_s1 + $0x3b0] sm:$0xff]  ;;  %v17_v45 = vld [vmem:[%s1126_s0 + $0x18] sm:$0xff]  ;;  %v88_v46 = vld [vmem:[%s1125_s1 + $0x220] sm:$0xff] }
  0x26   :  { %337 = vmatpush.msrb.mxu0 %v97_v6  ;;  %356 = vmatpush.msrb.mxu1 %v114_v7  ;;  %v105_v47 = vld [vmem:[%s1125_s1 + $0x2a8] sm:$0xff]  ;;  %228 = vst [vmem:[#allocation1 + $0x30] ss:$2 sm:$0xff] %v17_v45  ;;  %v229_v49 = vld.sshfl [vmem:[#allocation1] sm:$0xff pattern:$0x75316420] }
  0x27   :  { %377 = vmatpush.msrb.mxu2 %v129_v8  ;;  %396 = vmatpush.msrb.mxu3 %v146_v9  ;;  %v19_v48 = vld [vmem:[%s1126_s0 + $0x28] sm:$0xff]  ;;  %v120_v51 = vld [vmem:[%s1125_s1 + $0x320] sm:$0xff]  ;;  %v231_v52 = vld.sshfl [vmem:[#allocation1 + $0x10] sm:$0xff pattern:$0x75316420] }
  0x28   :  { %338 = vmatpush.msrb.mxu0 %v96_v10  ;;  %357 = vmatpush.msrb.mxu1 %v113_v11  ;;  %v861_v50 = vld.sshfl [vmem:[#allocation1 + $0x8] sm:$0xff pattern:$0x75316420]  ;;  %v232_v54 = vld.sshfl [vmem:[#allocation1 + $0x18] sm:$0xff pattern:$0x75316420] }
  0x29   :  { %378 = vmatpush.msrb.mxu2 %v128_v12  ;;  %397 = vmatpush.msrb.mxu3 %v145_v13  ;;  %237 = vst [vmem:[#allocation1] ss:$2 sm:$0xff] %v18_v44  ;;  %v137_v53 = vld [vmem:[%s1125_s1 + $0x3a8] sm:$0xff]  ;;  %v16_v55 = vld [vmem:[%s1126_s0 + $0x10] sm:$0xff]  ;;  %v87_v56 = vld [vmem:[%s1125_s1 + $0x218] sm:$0xff] }
  0x2a   :  { %339 = vmatpush.msrb.mxu0 %v95_v14  ;;  %358 = vmatpush.msrb.mxu1 %v112_v15  ;;  %v104_v57 = vld [vmem:[%s1125_s1 + $0x2a0] sm:$0xff]  ;;  %238 = vst [vmem:[#allocation1 + $0x10] ss:$2 sm:$0xff] %v19_v48  ;;  %v119_v58 = vld [vmem:[%s1125_s1 + $0x318] sm:$0xff]  ;;  %v86_v60 = vld [vmem:[%s1125_s1 + $0x210] sm:$0xff] }
  0x2b   :  { %379 = vmatpush.msrb.mxu2 %v127_v16  ;;  %398 = vmatpush.msrb.mxu3 %v144_v17  ;;  %v136_v59 = vld [vmem:[%s1125_s1 + $0x3a0] sm:$0xff]  ;;  %226 = vst [vmem:[#allocation1 + $0x20] ss:$2 sm:$0xff] %v16_v55  ;;  %v103_v61 = vld [vmem:[%s1125_s1 + $0x298] sm:$0xff]  ;;  %v118_v62 = vld [vmem:[%s1125_s1 + $0x310] sm:$0xff] }
  0x2c   :  { %340 = vmatpush.msrb.mxu0 %v94_v18  ;;  %359 = vmatpush.msrb.mxu1 %v111_v19  ;;  %v135_v63 = vld [vmem:[%s1125_s1 + $0x398] sm:$0xff]  ;;  %v85_v0 = vld [vmem:[%s1125_s1 + $0x208] sm:$0xff]  ;;  %v102_v1 = vld [vmem:[%s1125_s1 + $0x290] sm:$0xff] }
  0x2d   :  { %380 = vmatpush.msrb.mxu2 %v126_v20  ;;  %399 = vmatpush.msrb.mxu3 %v143_v21  ;;  %v117_v2 = vld [vmem:[%s1125_s1 + $0x308] sm:$0xff]  ;;  %v134_v3 = vld [vmem:[%s1125_s1 + $0x390] sm:$0xff]  ;;  %v84_v4 = vld [vmem:[%s1125_s1 + $0x200] sm:$0xff] }
  0x2e   :  { %341 = vmatpush.msrb.mxu0 %v93_v22  ;;  %360 = vmatpush.msrb.mxu1 %v110_v23  ;;  %v101_v5 = vld [vmem:[%s1125_s1 + $0x288] sm:$0xff]  ;;  %v116_v6 = vld [vmem:[%s1125_s1 + $0x300] sm:$0xff]  ;;  %v163_v8 = vld [vmem:[%s1125_s1 + $0x478] sm:$0xff] }
  0x2f   :  { %381 = vmatpush.msrb.mxu2 %v125_v24  ;;  %400 = vmatpush.msrb.mxu3 %v142_v25  ;;  %v133_v7 = vld [vmem:[%s1125_s1 + $0x388] sm:$0xff]  ;;  %v195_v9 = vld [vmem:[%s1125_s1 + $0x578] sm:$0xff]  ;;  %v100_v10 = vld [vmem:[%s1125_s1 + $0x280] sm:$0xff] }
  0x30   :  { %342 = vmatpush.msrb.mxu0 %v92_v28  ;;  %361 = vmatpush.msrb.mxu1 %v109_v29  ;;  %v132_v11 = vld [vmem:[%s1125_s1 + $0x380] sm:$0xff]  ;;  %v162_v12 = vld [vmem:[%s1125_s1 + $0x470] sm:$0xff]  ;;  %v179_v13 = vld [vmem:[%s1125_s1 + $0x4f8] sm:$0xff] }
  0x31   :  { %382 = vmatpush.msrb.mxu2 %v124_v30  ;;  %401 = vmatpush.msrb.mxu3 %v141_v31  ;;  %v194_v14 = vld [vmem:[%s1125_s1 + $0x570] sm:$0xff]  ;;  %v211_v15 = vld [vmem:[%s1125_s1 + $0x5f8] sm:$0xff]  ;;  %v161_v16 = vld [vmem:[%s1125_s1 + $0x468] sm:$0xff] }
  0x32   :  { %343 = vmatpush.msrb.mxu0 %v91_v32  ;;  %362 = vmatpush.msrb.mxu1 %v108_v33  ;;  %v178_v17 = vld [vmem:[%s1125_s1 + $0x4f0] sm:$0xff]  ;;  %v193_v18 = vld [vmem:[%s1125_s1 + $0x568] sm:$0xff]  ;;  %v160_v20 = vld [vmem:[%s1125_s1 + $0x460] sm:$0xff] }
  0x33   :  { %383 = vmatpush.msrb.mxu2 %v123_v34  ;;  %402 = vmatpush.msrb.mxu3 %v140_v35  ;;  %v210_v19 = vld [vmem:[%s1125_s1 + $0x5f0] sm:$0xff]  ;;  %v177_v21 = vld [vmem:[%s1125_s1 + $0x4e8] sm:$0xff]  ;;  %v192_v22 = vld [vmem:[%s1125_s1 + $0x560] sm:$0xff] }
  0x34   :  { %344 = vmatpush.msrb.mxu0 %v90_v36  ;;  %363 = vmatpush.msrb.mxu1 %v107_v37  ;;  %v209_v23 = vld [vmem:[%s1125_s1 + $0x5e8] sm:$0xff]  ;;  %v235_v24 = vld.sshfl [vmem:[#allocation1 + $0x30] sm:$0xff pattern:$0x75316420]  ;;  %v159_v25 = vld [vmem:[%s1125_s1 + $0x458] sm:$0xff] }
  0x35   :  { %384 = vmatpush.msrb.mxu2 %v122_v38  ;;  %403 = vmatpush.msrb.mxu3 %v139_v39  ;;  %v176_v26 = vld [vmem:[%s1125_s1 + $0x4e0] sm:$0xff]  ;;  %v191_v27 = vld [vmem:[%s1125_s1 + $0x558] sm:$0xff]  ;;  %v158_v31 = vld [vmem:[%s1125_s1 + $0x450] sm:$0xff] }
  0x36   :  { %345 = vmatpush.msrb.mxu0 %v89_v40  ;;  %364 = vmatpush.msrb.mxu1 %v106_v41  ;;  %v208_v28 = vld [vmem:[%s1125_s1 + $0x5e0] sm:$0xff]  ;;  %v236_v30 = vld.sshfl [vmem:[#allocation1 + $0x38] sm:$0xff pattern:$0x75316420]  ;;  %v190_v33 = vld [vmem:[%s1125_s1 + $0x550] sm:$0xff] }
  0x37   :  { %385 = vmatpush.msrb.mxu2 %v121_v42  ;;  %404 = vmatpush.msrb.mxu3 %v138_v43  ;;  %v233_v29 = vld.sshfl [vmem:[#allocation1 + $0x20] sm:$0xff pattern:$0x75316420]  ;;  %v175_v32 = vld [vmem:[%s1125_s1 + $0x4d8] sm:$0xff]  ;;  %v157_v36 = vld [vmem:[%s1125_s1 + $0x448] sm:$0xff] }
  0x38   :  { %346 = vmatpush.msrb.mxu0 %v88_v46  ;;  %365 = vmatpush.msrb.mxu1 %v105_v47  ;;  %v207_v34 = vld [vmem:[%s1125_s1 + $0x5d8] sm:$0xff]  ;;  %v234_v35 = vld.sshfl [vmem:[#allocation1 + $0x28] sm:$0xff pattern:$0x75316420]  ;;  %v174_v37 = vld [vmem:[%s1125_s1 + $0x4d0] sm:$0xff] }
  0x39   :  { %386 = vmatpush.msrb.mxu2 %v120_v51  ;;  %405 = vmatpush.msrb.mxu3 %v137_v53  ;;  %v189_v38 = vld [vmem:[%s1125_s1 + $0x548] sm:$0xff]  ;;  %v206_v39 = vld [vmem:[%s1125_s1 + $0x5d0] sm:$0xff]  ;;  %v156_v40 = vld [vmem:[%s1125_s1 + $0x440] sm:$0xff] }
  0x3a   :  { %347 = vmatpush.msrb.mxu0 %v87_v56  ;;  %366 = vmatpush.msrb.mxu1 %v104_v57  ;;  %v173_v41 = vld [vmem:[%s1125_s1 + $0x4c8] sm:$0xff]  ;;  %v188_v42 = vld [vmem:[%s1125_s1 + $0x540] sm:$0xff]  ;;  %v155_v44 = vld [vmem:[%s1125_s1 + $0x438] sm:$0xff] }
  0x3b   :  { %387 = vmatpush.msrb.mxu2 %v119_v58  ;;  %406 = vmatpush.msrb.mxu3 %v136_v59  ;;  %v205_v43 = vld [vmem:[%s1125_s1 + $0x5c8] sm:$0xff]  ;;  %v172_v45 = vld [vmem:[%s1125_s1 + $0x4c0] sm:$0xff]  ;;  %v187_v46 = vld [vmem:[%s1125_s1 + $0x538] sm:$0xff] }
  0x3c   :  { %348 = vmatpush.msrb.mxu0 %v86_v60  ;;  %367 = vmatpush.msrb.mxu1 %v103_v61  ;;  %v204_v47 = vld [vmem:[%s1125_s1 + $0x5c0] sm:$0xff]  ;;  %v154_v48 = vld [vmem:[%s1125_s1 + $0x430] sm:$0xff]  ;;  %v203_v51 = vld [vmem:[%s1125_s1 + $0x5b8] sm:$0xff] }
  0x3d   :  { %388 = vmatpush.msrb.mxu2 %v118_v62  ;;  %407 = vmatpush.msrb.mxu3 %v135_v63  ;;  %v170_v53 = vld [vmem:[%s1125_s1 + $0x4b0] sm:$0xff]  ;;  %v152_v56 = vld [vmem:[%s1125_s1 + $0x420] sm:$0xff]  ;;  %v169_v57 = vld [vmem:[%s1125_s1 + $0x4a8] sm:$0xff] }
  0x3e   :  { %349 = vmatpush.msrb.mxu0 %v85_v0  ;;  %368 = vmatpush.msrb.mxu1 %v102_v1  ;;  %v202_v55 = vld [vmem:[%s1125_s1 + $0x5b0] sm:$0xff]  ;;  %v184_v58 = vld [vmem:[%s1125_s1 + $0x520] sm:$0xff]  ;;  %v201_v59 = vld [vmem:[%s1125_s1 + $0x5a8] sm:$0xff] }
  0x3f   :  { %389 = vmatpush.msrb.mxu2 %v117_v2  ;;  %408 = vmatpush.msrb.mxu3 %v134_v3  ;;  %v151_v60 = vld [vmem:[%s1125_s1 + $0x418] sm:$0xff]  ;;  %v168_v61 = vld [vmem:[%s1125_s1 + $0x4a0] sm:$0xff]  ;;  %v150_v0 = vld [vmem:[%s1125_s1 + $0x410] sm:$0xff] }
  0x40   :  { %350 = vmatpush.msrb.mxu0 %v84_v4  ;;  %369 = vmatpush.msrb.mxu1 %v101_v5  ;;  %v183_v62 = vld [vmem:[%s1125_s1 + $0x518] sm:$0xff]  ;;  %v200_v63 = vld [vmem:[%s1125_s1 + $0x5a0] sm:$0xff]  ;;  %v182_v2 = vld [vmem:[%s1125_s1 + $0x510] sm:$0xff] }
  0x41   :  { %390 = vmatpush.msrb.mxu2 %v116_v6  ;;  %409 = vmatpush.msrb.mxu3 %v133_v7  ;;  %v167_v1 = vld [vmem:[%s1125_s1 + $0x498] sm:$0xff]  ;;  %v149_v4 = vld [vmem:[%s1125_s1 + $0x408] sm:$0xff]  ;;  %v166_v5 = vld [vmem:[%s1125_s1 + $0x490] sm:$0xff] }
  0x42   :  { %271 = vmatmul.f32.vlgmr.msra.gmra.mxu0 %v229_v49  ;;  %311 = vmatmul.f32.vlgmr.msra.gmra.mxu2 %v231_v52  ;;  %v171_v49 = vld [vmem:[%s1125_s1 + $0x4b8] sm:$0xff]  ;;  %v153_v52 = vld [vmem:[%s1125_s1 + $0x428] sm:$0xff]  ;;  %v198_v7 = vld [vmem:[%s1125_s1 + $0x590] sm:$0xff] }
  0x43   :  { %415 = vmatpush.msra.mxu0 %v163_v8  ;;  %455 = vmatpush.msra.mxu2 %v195_v9  ;;  %v199_v3 = vld [vmem:[%s1125_s1 + $0x598] sm:$0xff]  ;;  %v181_v6 = vld [vmem:[%s1125_s1 + $0x508] sm:$0xff]  ;;  %v148_v8 = vld [vmem:[%s1125_s1 + $0x400] sm:$0xff] }
  0x44   :  { %370 = vmatpush.msrb.mxu1 %v100_v10  ;;  %410 = vmatpush.msrb.mxu3 %v132_v11  ;;  %v165_v9 = vld [vmem:[%s1125_s1 + $0x488] sm:$0xff]  ;;  %v180_v10 = vld [vmem:[%s1125_s1 + $0x500] sm:$0xff] }
  0x45   :  { %291 = vmatmul.f32.vlgmr.msra.gmra.mxu1 %v861_v50  ;;  %331 = vmatmul.f32.vlgmr.msra.gmra.mxu3 %v232_v54  ;;  %v186_v50 = vld [vmem:[%s1125_s1 + $0x530] sm:$0xff]  ;;  %v185_v54 = vld [vmem:[%s1125_s1 + $0x528] sm:$0xff] }
  0x46   :  { %416 = vmatpush.msra.mxu0 %v162_v12  ;;  %435 = vmatpush.msra.mxu1 %v179_v13  ;;  %v197_v11 = vld [vmem:[%s1125_s1 + $0x588] sm:$0xff]  ;;  %v239_v12 = vld.sshfl [vmem:[#allocation1] sm:$0xff pattern:$0x75316420] }
  0x47   :  { %456 = vmatpush.msra.mxu2 %v194_v14  ;;  %475 = vmatpush.msra.mxu3 %v211_v15  ;;  %v241_v13 = vld.sshfl [vmem:[#allocation1 + $0x10] sm:$0xff pattern:$0x75316420]  ;;  %v164_v14 = vld [vmem:[%s1125_s1 + $0x480] sm:$0xff] }
  0x48   :  { %417 = vmatpush.msra.mxu0 %v161_v16  ;;  %436 = vmatpush.msra.mxu1 %v178_v17  ;;  %v196_v15 = vld [vmem:[%s1125_s1 + $0x580] sm:$0xff]  ;;  %v240_v16 = vld.sshfl [vmem:[#allocation1 + $0x8] sm:$0xff pattern:$0x75316420] }
  0x49   :  { %457 = vmatpush.msra.mxu2 %v193_v18  ;;  %476 = vmatpush.msra.mxu3 %v210_v19  ;;  %v242_v17 = vld.sshfl [vmem:[#allocation1 + $0x18] sm:$0xff pattern:$0x75316420]  ;;  %v501_v18 = vld [vmem:[%s1127_s2] ss:$0 sm:$0xff] }
  0x4a   :  { %418 = vmatpush.msra.mxu0 %v160_v20  ;;  %437 = vmatpush.msra.mxu1 %v177_v21 }
  0x4b   :  { %458 = vmatpush.msra.mxu2 %v192_v22  ;;  %477 = vmatpush.msra.mxu3 %v209_v23 }
  0x4c   :  { %391 = vmatmul.f32.vlgmr.msrb.gmra.mxu2 %v235_v24  ;;  %419 = vmatpush.msra.mxu0 %v159_v25 }
  0x4d   :  { %438 = vmatpush.msra.mxu1 %v176_v26  ;;  %459 = vmatpush.msra.mxu2 %v191_v27 }
  0x4e   :  { %478 = vmatpush.msra.mxu3 %v208_v28  ;;  %351 = vmatmul.f32.vlgmr.msrb.gmra.mxu0 %v233_v29 }
  0x4f   :  { %411 = vmatmul.f32.vlgmr.msrb.gmra.mxu3 %v236_v30  ;;  %420 = vmatpush.msra.mxu0 %v158_v31 }
  0x50   :  { %439 = vmatpush.msra.mxu1 %v175_v32  ;;  %460 = vmatpush.msra.mxu2 %v190_v33 }
  0x51   :  { %479 = vmatpush.msra.mxu3 %v207_v34  ;;  %371 = vmatmul.f32.vlgmr.msrb.gmra.mxu1 %v234_v35 }
  0x52   :  { %421 = vmatpush.msra.mxu0 %v157_v36  ;;  %440 = vmatpush.msra.mxu1 %v174_v37 }
  0x53   :  { %461 = vmatpush.msra.mxu2 %v189_v38  ;;  %480 = vmatpush.msra.mxu3 %v206_v39 }
  0x54   :  { %422 = vmatpush.msra.mxu0 %v156_v40  ;;  %441 = vmatpush.msra.mxu1 %v173_v41 }
  0x55   :  { %462 = vmatpush.msra.mxu2 %v188_v42  ;;  %481 = vmatpush.msra.mxu3 %v205_v43 }
  0x56   :  { %423 = vmatpush.msra.mxu0 %v155_v44  ;;  %442 = vmatpush.msra.mxu1 %v172_v45 }
  0x57   :  { %463 = vmatpush.msra.mxu2 %v187_v46  ;;  %482 = vmatpush.msra.mxu3 %v204_v47 }
  0x58   :  { %424 = vmatpush.msra.mxu0 %v154_v48  ;;  %443 = vmatpush.msra.mxu1 %v171_v49 }
  0x59   :  { %464 = vmatpush.msra.mxu2 %v186_v50  ;;  %483 = vmatpush.msra.mxu3 %v203_v51 }
  0x5a   :  { %425 = vmatpush.msra.mxu0 %v153_v52  ;;  %444 = vmatpush.msra.mxu1 %v170_v53 }
  0x5b   :  { %465 = vmatpush.msra.mxu2 %v185_v54  ;;  %484 = vmatpush.msra.mxu3 %v202_v55 }
  0x5c   :  { %426 = vmatpush.msra.mxu0 %v152_v56  ;;  %445 = vmatpush.msra.mxu1 %v169_v57 }
  0x5d   :  { %466 = vmatpush.msra.mxu2 %v184_v58  ;;  %485 = vmatpush.msra.mxu3 %v201_v59 }
  0x5e   :  { %427 = vmatpush.msra.mxu0 %v151_v60  ;;  %446 = vmatpush.msra.mxu1 %v168_v61 }
  0x5f   :  { %467 = vmatpush.msra.mxu2 %v183_v62  ;;  %486 = vmatpush.msra.mxu3 %v200_v63 }
  0x60   :  { %428 = vmatpush.msra.mxu0 %v150_v0  ;;  %447 = vmatpush.msra.mxu1 %v167_v1 }
  0x61   :  { %468 = vmatpush.msra.mxu2 %v182_v2  ;;  %487 = vmatpush.msra.mxu3 %v199_v3 }
  0x62   :  { %429 = vmatpush.msra.mxu0 %v149_v4  ;;  %448 = vmatpush.msra.mxu1 %v166_v5 }
  0x63   :  { %469 = vmatpush.msra.mxu2 %v181_v6  ;;  %488 = vmatpush.msra.mxu3 %v198_v7 }
  0x64   :  { %430 = vmatpush.msra.mxu0 %v148_v8  ;;  %449 = vmatpush.msra.mxu1 %v165_v9 }
  0x65   :  { %470 = vmatpush.msra.mxu2 %v180_v10  ;;  %489 = vmatpush.msra.mxu3 %v197_v11 }
  0x66   :  { %431 = vmatmul.f32.vlgmr.msra.gmra.mxu0 %v239_v12  ;;  %471 = vmatmul.f32.vlgmr.msra.gmra.mxu2 %v241_v13 }
  0x67   :  { %450 = vmatpush.msra.mxu1 %v164_v14  ;;  %490 = vmatpush.msra.mxu3 %v196_v15 }
  0x68   :  { %451 = vmatmul.f32.vlgmr.msra.gmra.mxu1 %v240_v16  ;;  %491 = vmatmul.f32.vlgmr.msra.gmra.mxu3 %v242_v17 }
  0xbf   :  { %v272_v19 = vpop.f32.mrf.mxu0 }
  0xc0   :  { %v273_v20 = vadd.f32 %v501_v18, %v272_v19 }
  0xc2   :  { %v292_v21 = vpop.f32.mrf.mxu1 }
  0xc3   :  { %v293_v22 = vadd.f32 %v292_v21, %v273_v20 }
  0xc5   :  { %v312_v23 = vpop.f32.mrf.mxu2 }
  0xc6   :  { %v313_v24 = vadd.f32 %v312_v23, %v293_v22 }
  0xc8   :  { %v332_v25 = vpop.f32.mrf.mxu3 }
  0xc9   :  { %v333_v26 = vadd.f32 %v332_v25, %v313_v24 }
  0xcb   :  { %v352_v27 = vpop.f32.mrf.mxu0 }
  0xcc   :  { %v353_v28 = vadd.f32 %v352_v27, %v333_v26 }
  0xce   :  { %v372_v29 = vpop.f32.mrf.mxu1 }
  0xcf   :  { %v373_v30 = vadd.f32 %v372_v29, %v353_v28  ;;  %v392_v31 = vpop.f32.mrf.mxu2 }
  0xd1   :  { %v393_v32 = vadd.f32 %v392_v31, %v373_v30 }
  0xd2   :  { %v412_v33 = vpop.f32.mrf.mxu3 }
  0xd3   :  { %v413_v34 = vadd.f32 %v412_v33, %v393_v32 }
  0xe3   :  { %v432_v35 = vpop.f32.mrf.mxu0 }
  0xe4   :  { %v433_v36 = vadd.f32 %v432_v35, %v413_v34 }
  0xe5   :  { %v452_v37 = vpop.f32.mrf.mxu1 }
  0xe6   :  { %v453_v38 = vadd.f32 %v452_v37, %v433_v36 }
  0xe9   :  { %v472_v39 = vpop.f32.mrf.mxu2 }
  0xea   :  { %v473_v40 = vadd.f32 %v472_v39, %v453_v38 }
  0xeb   :  { %v492_v41 = vpop.f32.mrf.mxu3 }
  0xec   :  { %v493_v42 = vadd.f32 %v492_v41, %v473_v40 }
  0xee   :  { %496 = vst.msk [vmem:[%s1128_s3] sm:$0xf] %vm495_vm0, %v493_v42 }

</bundles_post_ra>
